<compile_context>
chip_gen: v5e
topology: v5e:2x2
jax: 0.10.0
libtpu: 0.0.40
codegen_flags: <defaults>
</compile_context>

<pallas_src>
import math

import jax
import jax.numpy as jnp
from jax.experimental import pallas as pl
from jax.experimental.pallas import tpu as pltpu


_TILE_BYTES_TARGET = 4 << 20     # ~4 MiB x-blocks (v7x roofline needs >= 4 MiB)
_TINY_BYTES = 4 << 20            # below this a pallas_call is pure overhead
_VMEM_LIMIT_BYTES = 32 << 20     # worst case ~24 MiB double-buffered x/out/pe


def _build_pe_table(d_model: int, max_len: int, dtype=jnp.float32) -> jnp.ndarray:
    """Positional-encoding buffer, mirroring the PyTorch __init__ (shape (max_len, D))."""
    position = jnp.arange(max_len, dtype=jnp.float32)[:, None]              # (max_len, 1)
    div_term = jnp.exp(
        jnp.arange(0, d_model, 2, dtype=jnp.float32)
        * (-math.log(10000.0) / d_model)
    )                                                                        # (ceil(D/2),)
    angles = position * div_term                                             # (max_len, ceil(D/2))
    pe = jnp.zeros((max_len, d_model), dtype=jnp.float32)
    pe = pe.at[:, 0::2].set(jnp.sin(angles))
    pe = pe.at[:, 1::2].set(jnp.cos(angles[:, : d_model // 2]))
    return pe.astype(dtype)


def _round_down_multiple(n: int, m: int) -> int:
    return (n // m) * m


def _sublane_multiple(dtype) -> int:
    # Sub-32-bit dtypes pack along sublanes: f32 -> 8, bf16 -> 16, int8/fp8 -> 32.
    return 8 * max(1, 4 // jnp.dtype(dtype).itemsize)


# ---------------------------------------------------------------------------
# Kernel
# ---------------------------------------------------------------------------

def _pe_add_kernel(x_ref, pe_ref, o_ref):
    # x_ref / o_ref: (tb, ts, D) in x.dtype; pe_ref: (ts, D) float32,
    # broadcast over the batch tile.  Accumulate in f32, cast back.
    o_ref[...] = (x_ref[...].astype(jnp.float32) + pe_ref[...]).astype(o_ref.dtype)


# ---------------------------------------------------------------------------
# Wrapper
# ---------------------------------------------------------------------------

def _pe_add_3d(x: jnp.ndarray, pe_slice: jnp.ndarray) -> jnp.ndarray:
    """x: (B, S, D) with D % 128 == 0, pe_slice: (S, D) float32."""
    B, S, D = x.shape
    itemsize = jnp.dtype(x.dtype).itemsize
    row_bytes = D * itemsize
    m = _sublane_multiple(x.dtype)

    # Sequence tile: cap by the x-block target AND by the f32 pe-block size
    # (so total double-buffered VMEM  2*x + 2*out + 2*pe  stays <= ~24 MiB),
    # then round down to a packed-sublane multiple (or take full S).
    ts = min(S,
             max(1, _TILE_BYTES_TARGET // row_bytes),
             max(1, _TILE_BYTES_TARGET // (D * 4)))
    if ts < S:
        ts = min(S, max(m, _round_down_multiple(ts, m)))
    if ts >= S or S <= m:
        ts = S

    # Batch tile: grow the block back up to ~target independent of S*D so the
    # ~0.35 us/step grid overhead stays amortized even for short sequences.
    tb = max(1, _TILE_BYTES_TARGET // (ts * row_bytes))
    tb = min(tb, B)

    # Grid: S-tiles OUTER, batch-tiles INNER -> the pe block index (s, 0) is
    # constant across consecutive inner steps, so its DMA is not re-issued.
    grid = (pl.cdiv(S, ts), pl.cdiv(B, tb))

    return pl.pallas_call(
        _pe_add_kernel,
        out_shape=jax.ShapeDtypeStruct((B, S, D), x.dtype),
        grid_spec=pltpu.PrefetchScalarGridSpec(
            num_scalar_prefetch=0,
            grid=grid,
            in_specs=[
                pl.BlockSpec((tb, ts, D), lambda s, b: (b, s, 0)),
                pl.BlockSpec((ts, D), lambda s, b: (s, 0)),
            ],
            out_specs=pl.BlockSpec((tb, ts, D), lambda s, b: (b, s, 0)),
        ),
        compiler_params=pltpu.CompilerParams(
            dimension_semantics=("parallel", "parallel"),
            vmem_limit_bytes=_VMEM_LIMIT_BYTES,
        ),
    )(x, pe_slice)


def positional_encoding_forward(x: jnp.ndarray, pe_table: jnp.ndarray,
                                *, force_pallas: bool = False) -> jnp.ndarray:
    """x: (B, S, D), pe_table: (max_len, D) -> x + pe[:S]  (out-of-place)."""
    B, S, D = x.shape
    assert pe_table.shape[0] >= S and pe_table.shape[1] == D
    # Keep pe in float32: the add accumulates in f32 and casts back to x.dtype,
    # matching the PyTorch f32 buffer promotion; pe traffic is only O(S*D).
    pe_slice = pe_table[:S, :].astype(jnp.float32)

    nbytes = B * S * D * jnp.dtype(x.dtype).itemsize
    if not force_pallas and nbytes < _TINY_BYTES:
        # Launch + per-step overhead dwarfs the work; let XLA fuse the add.
        return (x.astype(jnp.float32) + pe_slice[None]).astype(x.dtype)

    if D % 128 == 0:
        return _pe_add_3d(x, pe_slice)

    # D not lane-aligned: zero-pad D to the next multiple of 128 so stores
    # stay unmasked (lane-sparse vst.msk measured up to ~4.5x slower), run the
    # same lane-dense 3-D path, then slice back.  For small D the (8,128)
    # tiled HBM layout already pads lanes, so the extra traffic is minimal.
    dp = ((D + 127) // 128) * 128
    xp = jnp.pad(x, ((0, 0), (0, 0), (0, dp - D)))
    pep = jnp.pad(pe_slice, ((0, 0), (0, dp - D)))
    out = _pe_add_3d(xp, pep)
    return out[:, :, :D]


if __name__ == "__main__":
    key = jax.random.PRNGKey(0)
    k1, k2, k3 = jax.random.split(key, 3)

    # --- Test 1: module-like small shape; D=32 not lane-aligned -> padded
    #             lane-dense 3-D Pallas path.
    B, S, D = 2, 8, 32
    MAX_LEN = 64
    x = jax.random.normal(k1, (B, S, D), dtype=jnp.float32)
    pe_table = _build_pe_table(D, MAX_LEN, dtype=jnp.float32)
    ref = x + pe_table[None, :S, :]
    out = positional_encoding_forward(x, pe_table, force_pallas=True)
    out = jax.block_until_ready(out)
    assert out.shape == (B, S, D)
    assert jnp.allclose(out, ref, atol=1e-6), "mismatch vs reference (padded path)"

    # --- Test 2: lane-aligned D=128 -> batch+sequence tiled 3-D Pallas path.
    B2, S2, D2 = 2, 16, 128
    x2 = jax.random.normal(k2, (B2, S2, D2), dtype=jnp.float32)
    pe_table2 = _build_pe_table(D2, 64, dtype=jnp.float32)
    ref2 = x2 + pe_table2[None, :S2, :]
    out2 = positional_encoding_forward(x2, pe_table2, force_pallas=True)
    out2 = jax.block_until_ready(out2)
    assert out2.shape == (B2, S2, D2)
    assert jnp.allclose(out2, ref2, atol=1e-6), "mismatch vs reference (3-D path)"

    # --- Test 3: bf16 activations -> f32-accumulate inside the kernel, packed
    #             sublane tiles.
    B3, S3, D3 = 2, 32, 128
    x3 = jax.random.normal(k3, (B3, S3, D3), dtype=jnp.float32).astype(jnp.bfloat16)
    pe_table3 = _build_pe_table(D3, 64, dtype=jnp.float32)
    ref3 = (x3.astype(jnp.float32) + pe_table3[None, :S3, :]).astype(jnp.bfloat16)
    out3 = positional_encoding_forward(x3, pe_table3, force_pallas=True)
    out3 = jax.block_until_ready(out3)
    assert out3.shape == (B3, S3, D3)
    assert jnp.allclose(out3.astype(jnp.float32), ref3.astype(jnp.float32),
                        atol=1e-2), "mismatch vs reference (bf16 path)"

    print("KERNEL_OK")
</pallas_src>

<mosaic_0001>
module attributes {stable_mosaic.version = 11 : i64} {
  func.func @_pe_add_kernel(%arg0: i32, %arg1: i32, %arg2: memref<2x8x128xf32, #tpu.memory_space<vmem>>, %arg3: memref<8x128xf32, #tpu.memory_space<vmem>>, %arg4: memref<2x8x128xf32, #tpu.memory_space<vmem>>) attributes {dimension_semantics = [#tpu.dimension_semantics<parallel>, #tpu.dimension_semantics<parallel>], iteration_bounds = array<i64: 1, 1>, scalar_prefetch = 0 : i64, scratch_operands = 0 : i64, tpu.core_type = #tpu.core_type<tc>, window_params = [{transform_indices = @transform_0, window_bounds = array<i64: 2, 8, 128>}, {transform_indices = @transform_1, window_bounds = array<i64: 8, 128>}, {transform_indices = @transform_2, window_bounds = array<i64: 2, 8, 128>}]} {
    %c0 = arith.constant 0 : index
    %c0_0 = arith.constant 0 : index
    %c0_1 = arith.constant 0 : index
    %0 = vector.load %arg2[%c0, %c0_0, %c0_1] : memref<2x8x128xf32, #tpu.memory_space<vmem>>, vector<2x8x128xf32>
    %c0_2 = arith.constant 0 : index
    %c0_3 = arith.constant 0 : index
    %1 = vector.load %arg3[%c0_2, %c0_3] : memref<8x128xf32, #tpu.memory_space<vmem>>, vector<8x128xf32>
    %2 = vector.shape_cast %1 : vector<8x128xf32> to vector<1x8x128xf32>
    %3 = vector.broadcast %2 : vector<1x8x128xf32> to vector<2x8x128xf32>
    %4 = arith.addf %0, %3 : vector<2x8x128xf32>
    %c0_4 = arith.constant 0 : index
    %c0_5 = arith.constant 0 : index
    %c0_6 = arith.constant 0 : index
    %5 = vector.load %arg4[%c0_4, %c0_5, %c0_6] : memref<2x8x128xf32, #tpu.memory_space<vmem>>, vector<2x8x128xf32>
    tpu.vector_store %arg4[%c0_4, %c0_5, %c0_6], %4 {strides = array<i32>} : memref<2x8x128xf32, #tpu.memory_space<vmem>>, vector<2x8x128xf32>,
    return
  }
  func.func @transform_0(%arg0: i32, %arg1: i32) -> (i32, i32, i32) {
    %c0_i32 = arith.constant 0 : i32
    %c0_i32_0 = arith.constant 0 : i32
    return %arg1, %arg0, %c0_i32 : i32, i32, i32
  }
  func.func @transform_1(%arg0: i32, %arg1: i32) -> (i32, i32) {
    %c0_i32 = arith.constant 0 : i32
    %c0_i32_0 = arith.constant 0 : i32
    return %arg0, %c0_i32 : i32, i32
  }
  func.func @transform_2(%arg0: i32, %arg1: i32) -> (i32, i32, i32) {
    %c0_i32 = arith.constant 0 : i32
    %c0_i32_0 = arith.constant 0 : i32
    return %arg1, %arg0, %c0_i32 : i32, i32, i32
  }
}

</mosaic_0001>

<bundles_post_ra>
// kernel: tpu_custom_call.1
= control target key start
LH: loop header
LB: loop body
LE: loop exit
PB: predicated region body
PF: predicated region fallthrough
CT: control target
= control target key end

     0   :  { %7 = vsyncpa [#allocation3], 0  ;;  %s181_s0 = inlined_call_operand.hbm [shape: f32[2,8,128], index: 0, kind: input, shape index: {}]   ;;  %s182_s1 = inlined_call_operand.hbm [shape: f32[8,128], index: 1, kind: input, shape index: {}]   ;;  %s183_s2 = inlined_call_operand.hbm [shape: f32[2,8,128], index: 2, kind: output, shape index: {}]  }
   0x1   :  { %8 = vsyncpa [#allocation6], 0 }
   0x2   :  { %9 = vsyncpa [#allocation4], 0  ;;  %s14_s11 = sshll.u32 %s181_s0, 4  ;;  %s152_s12 = smov [#allocation2]   ;;  %s15_s11 = int_to_ptr.hbm [resolvable:$true] %s14_s11 }
   0x3   :  { %s16_s13 = sshll.u32 %s152_s12, 4  ;;  %s28_s16 = sshll.u32 %s182_s1, 4  ;;  %s17_s13 = int_to_ptr.vmem [resolvable:$true] %s16_s13  ;;  %s29_s16 = int_to_ptr.hbm [resolvable:$true] %s28_s16 }
   0x4   :  { %s153_s17 = smov 128   ;;  %s154_s18 = smov 8  }
   0x5   :  { %22 = dma.hbm_to_vmem [thread:$0]  %s15_s11, 256, %s17_s13, [#allocation3], %s153_s17, %s153_s17, %s154_s18  }
   0x6   :  { %s155_s19 = smov [#allocation5]  }
   0x7   :  { %s30_s20 = sshll.u32 %s155_s19, 4  ;;  %s31_s20 = int_to_ptr.vmem [resolvable:$true] %s30_s20 }
   0x8   :  { %33 = dma.hbm_to_vmem [thread:$0]  %s29_s16, 128, %s31_s20, [#allocation6]  }
   0x9   :  { %146 = dma.done.wait [#allocation3], 256  }
   0xa   :  { %147 = vsyncadd [#allocation3], 4294967040 }
   0xb   :  { %148 = dma.done.wait [#allocation6], 128  }
   0xc   :  { %149 = vsyncadd [#allocation6], 4294967168  ;;  %s156_s0 = smov [#allocation7]   ;;  %s55_s24 = sshll.u32 %s183_s2, 4  ;;  %v42_v0 = vld [vmem:[#allocation2] sm:$0xff]  ;;  %v44_v1 = vld [vmem:[#allocation5] sm:$0xff]  ;;  %s56_s24 = int_to_ptr.hbm [resolvable:$true] %s55_s24 }
   0xd   :  { %s53_s21 = sshll.u32 %s156_s0, 4  ;;  %v43_v2 = vld [vmem:[#allocation2 + $0x8] sm:$0xff]  ;;  %v45_v3 = vadd.f32 %v44_v1, %v42_v0  ;;  %s54_s21 = int_to_ptr.vmem [resolvable:$true] %s53_s21 }
   0xe   :  { %v46_v4 = vadd.f32 %v44_v1, %v43_v2 }
   0xf   :  { %47 = vst [vmem:[#allocation7] sm:$0xff] %v45_v3 }
  0x10   :  { %48 = vst [vmem:[#allocation7 + $0x8] sm:$0xff] %v46_v4 }
  0x11   :  { %61 = dma.vmem_to_hbm [thread:$0]  %s54_s21, 256, %s56_s24, [#allocation4], %s153_s17, %s153_s17, %s154_s18  }
  0x12   :  { %150 = dma.done.wait [#allocation4], 256  }
  0x13   :  { %151 = vsyncadd [#allocation4], 4294967040 }
  0x14   :  { %66 = vsyncpa [#allocation3], 1 }
  0x15   :  { %67 = vsyncpa [#allocation6], 1 }
  0x16   :  { %68 = vsyncpa [#allocation4], 1 }

</bundles_post_ra>
